<compile_context>
chip_gen: v6e
topology: v6e:2x2x1
jax: 0.10.0
libtpu: 0.0.40
codegen_flags: <defaults>
</compile_context>

<pallas_src>
import functools

import jax
import jax.numpy as jnp
from jax.experimental import pallas as pl
from jax.experimental.pallas import tpu as pltpu


# ~4 MiB per block => ~16 MiB total pipelined VMEM (2 bufs x (in + out)),
# safely under the 64 MiB physical VMEM of v7x and default/raised scoped
# limits on v5e/v6e.
_TARGET_BLOCK_BYTES = 4 * 1024 * 1024
_VMEM_LIMIT_BYTES = 64 * 1024 * 1024


def _round_up(a: int, b: int) -> int:
    return ((a + b - 1) // b) * b


def _sd_kernel(scale_ref, x_ref, o_ref):
    # scale_ref: (tn, 1) in x.dtype, broadcast over the lane (feature) axis.
    o_ref[...] = x_ref[...] * scale_ref[...]


def stochastic_depth_pallas(x, p, mode, training=True, key=None):
    """Pallas equivalent of torchvision's stochastic_depth()."""
    if p < 0.0 or p > 1.0:
        raise ValueError(f"drop probability has to be between 0 and 1, but got {p}")
    if mode not in ("batch", "row"):
        raise ValueError(f"mode has to be either 'batch' or 'row', but got {mode}")
    if (not training) or p == 0.0:
        return x

    if key is None:
        # TODO(synk): callers should pass a fresh PRNG key per training step,
        # otherwise the drop pattern repeats across calls.
        key = jax.random.PRNGKey(0)

    survival_rate = 1.0 - float(p)

    n = x.shape[0]
    f = 1
    for d in x.shape[1:]:
        f *= d
    f = max(f, 1)
    x2 = x.reshape(n, f)

    itemsize = jnp.dtype(x.dtype).itemsize

    # ---- byte-budget-driven 2D tiling -------------------------------------
    # Feature tile: either the full feature axis (any width allowed when the
    # block spans the whole dim) or a lane-aligned multiple of 128.
    max_tf = max(128, (_TARGET_BLOCK_BYTES // (8 * itemsize)) // 128 * 128)
    if f <= max_tf:
        tf = f
        fp = f
    else:
        tf = max_tf
        fp = _round_up(f, tf)

    # Row tile: full batch if it fits the budget, else a multiple of 8 rows.
    max_tn = max(8, (_TARGET_BLOCK_BYTES // (tf * itemsize)) // 8 * 8)
    if n <= max_tn:
        tn = n
        np_ = n
    else:
        tn = max_tn
        np_ = _round_up(n, tn)

    # Pad (zeros) only if we actually had to tile a ragged axis.
    if np_ != n or fp != f:
        x2p = jnp.pad(x2, ((0, np_ - n), (0, fp - f)))
    else:
        x2p = x2

    # ---- keep mask (hoisted out of the kernel, drawn once) -----------------
    if mode == "row":
        keep = jax.random.bernoulli(key, survival_rate, (n,))
    else:  # "batch"
        keep = jnp.broadcast_to(jax.random.bernoulli(key, survival_rate, (1,)), (n,))

    if survival_rate > 0.0:
        scale = keep.astype(jnp.float32) * (1.0 / survival_rate)
    else:  # p == 1.0 -> everything dropped, no rescale (matches torch)
        scale = jnp.zeros((n,), jnp.float32)
    scale = scale.astype(x.dtype).reshape(n, 1)
    if np_ != n:
        scale = jnp.pad(scale, ((0, np_ - n), (0, 0)))

    grid = (np_ // tn, fp // tf)

    out2p = pl.pallas_call(
        _sd_kernel,
        out_shape=jax.ShapeDtypeStruct((np_, fp), x.dtype),
        grid_spec=pltpu.PrefetchScalarGridSpec(
            num_scalar_prefetch=0,
            grid=grid,
            in_specs=[
                pl.BlockSpec((tn, 1), lambda i, j: (i, 0)),   # per-row scale
                pl.BlockSpec((tn, tf), lambda i, j: (i, j)),  # x tile
            ],
            out_specs=pl.BlockSpec((tn, tf), lambda i, j: (i, j)),
        ),
        compiler_params=pltpu.CompilerParams(
            dimension_semantics=("parallel", "parallel"),
            vmem_limit_bytes=_VMEM_LIMIT_BYTES,
        ),
    )(scale, x2p)

    out2 = out2p[:n, :f] if (np_ != n or fp != f) else out2p
    return out2.reshape(x.shape)


class StochasticDepth:
    """Mirror of the PyTorch nn.Module (no learnable parameters)."""

    def __init__(self, p: float, mode: str):
        self.p = p
        self.mode = mode
        self.training = True

    def __call__(self, x, key=None):
        return stochastic_depth_pallas(x, self.p, self.mode, self.training, key)

    def __repr__(self):
        return f"StochasticDepth(p={self.p}, mode={self.mode})"


if __name__ == "__main__":
    key = jax.random.PRNGKey(0)
    # Small NCHW input consistent with the module's usage in MViT residuals.
    x = jax.random.normal(key, (2, 4, 16, 16), dtype=jnp.float32)

    p = 0.3
    sr = 1.0 - p

    # --- mode="row", training=True ---
    mod_row = StochasticDepth(p=p, mode="row")
    out_row = jax.block_until_ready(mod_row(x, key=jax.random.PRNGKey(123)))
    assert out_row.shape == x.shape and out_row.dtype == x.dtype
    xr = x.reshape(x.shape[0], -1)
    orr = out_row.reshape(x.shape[0], -1)
    for i in range(x.shape[0]):
        dropped = bool(jnp.allclose(orr[i], 0.0, atol=1e-6))
        kept = bool(jnp.allclose(orr[i], xr[i] / sr, rtol=1e-5, atol=1e-5))
        assert dropped or kept, f"row {i}: neither dropped nor scaled-kept"

    # --- mode="batch", training=True ---
    mod_batch = StochasticDepth(p=p, mode="batch")
    out_batch = jax.block_until_ready(mod_batch(x, key=jax.random.PRNGKey(7)))
    dropped = bool(jnp.allclose(out_batch, 0.0, atol=1e-6))
    kept = bool(jnp.allclose(out_batch, x / sr, rtol=1e-5, atol=1e-5))
    assert dropped or kept, "batch mode: neither dropped nor scaled-kept"

    # --- bf16 input, row mode (native-dtype path) ---
    xb = jax.random.normal(jax.random.PRNGKey(3), (2, 4, 16, 16), dtype=jnp.bfloat16)
    out_bf16 = jax.block_until_ready(
        StochasticDepth(p=p, mode="row")(xb, key=jax.random.PRNGKey(11)))
    assert out_bf16.shape == xb.shape and out_bf16.dtype == xb.dtype

    # --- p=1.0: all dropped, no rescale ---
    out_p1 = jax.block_until_ready(
        StochasticDepth(p=1.0, mode="row")(x, key=jax.random.PRNGKey(5)))
    assert bool(jnp.allclose(out_p1, 0.0, atol=1e-6)), "p=1 must zero everything"

    # --- training=False: identity ---
    mod_eval = StochasticDepth(p=p, mode="row")
    mod_eval.training = False
    out_eval = jax.block_until_ready(mod_eval(x))
    assert bool(jnp.array_equal(out_eval, x)), "eval mode must be identity"

    # --- p=0.0: identity ---
    mod_p0 = StochasticDepth(p=0.0, mode="row")
    out_p0 = jax.block_until_ready(mod_p0(x))
    assert bool(jnp.array_equal(out_p0, x)), "p=0 must be identity"

    print("KERNEL_OK")
</pallas_src>

<mosaic_0001>
module attributes {stable_mosaic.version = 11 : i64} {
  func.func @_sd_kernel(%arg0: i32, %arg1: i32, %arg2: memref<2x1xf32, #tpu.memory_space<vmem>>, %arg3: memref<2x1024xf32, #tpu.memory_space<vmem>>, %arg4: memref<2x1024xf32, #tpu.memory_space<vmem>>) attributes {dimension_semantics = [#tpu.dimension_semantics<parallel>, #tpu.dimension_semantics<parallel>], iteration_bounds = array<i64: 1, 1>, scalar_prefetch = 0 : i64, scratch_operands = 0 : i64, tpu.core_type = #tpu.core_type<tc>, window_params = [{transform_indices = @transform_0, window_bounds = array<i64: 2, 1>}, {transform_indices = @transform_1, window_bounds = array<i64: 2, 1024>}, {transform_indices = @transform_2, window_bounds = array<i64: 2, 1024>}]} {
    %c0 = arith.constant 0 : index
    %c0_0 = arith.constant 0 : index
    %0 = vector.load %arg3[%c0, %c0_0] : memref<2x1024xf32, #tpu.memory_space<vmem>>, vector<2x1024xf32>
    %c0_1 = arith.constant 0 : index
    %c0_2 = arith.constant 0 : index
    %1 = vector.load %arg2[%c0_1, %c0_2] : memref<2x1xf32, #tpu.memory_space<vmem>>, vector<2x1xf32>
    %2 = vector.broadcast %1 : vector<2x1xf32> to vector<2x1024xf32>
    %3 = arith.mulf %0, %2 : vector<2x1024xf32>
    %c0_3 = arith.constant 0 : index
    %c0_4 = arith.constant 0 : index
    %4 = vector.load %arg4[%c0_3, %c0_4] : memref<2x1024xf32, #tpu.memory_space<vmem>>, vector<2x1024xf32>
    tpu.vector_store %arg4[%c0_3, %c0_4], %3 {strides = array<i32>} : memref<2x1024xf32, #tpu.memory_space<vmem>>, vector<2x1024xf32>,
    return
  }
  func.func @transform_0(%arg0: i32, %arg1: i32) -> (i32, i32) {
    %c0_i32 = arith.constant 0 : i32
    %c0_i32_0 = arith.constant 0 : i32
    return %arg0, %c0_i32 : i32, i32
  }
  func.func @transform_1(%arg0: i32, %arg1: i32) -> (i32, i32) {
    %c0_i32 = arith.constant 0 : i32
    return %arg0, %arg1 : i32, i32
  }
  func.func @transform_2(%arg0: i32, %arg1: i32) -> (i32, i32) {
    %c0_i32 = arith.constant 0 : i32
    return %arg0, %arg1 : i32, i32
  }
}

</mosaic_0001>

<bundles_post_ra>
// kernel: tpu_custom_call.1
= control target key start
LH: loop header
LB: loop body
LE: loop exit
PB: predicated region body
PF: predicated region fallthrough
CT: control target
= control target key end

     0   :  { %7 = vsyncpa [#allocation3], 0  ;;  %s135_s0 = inlined_call_operand.vmem [shape: f32[2,1], index: 0, kind: input, shape index: {}]   ;;  %s136_s1 = inlined_call_operand.hbm [shape: f32[2,1024], index: 1, kind: input, shape index: {}]   ;;  %s137_s2 = inlined_call_operand.hbm [shape: f32[2,1024], index: 2, kind: output, shape index: {}]  }
   0x1   :  { %8 = vsyncpa [#allocation4], 0  ;;  %s107_s9 = smov [#allocation2]  }
   0x2   :  { %s17_s10 = sshll.u32 %s107_s9, 4  ;;  %s18_s10 = int_to_ptr.vmem [resolvable:$true] %s17_s10 }
   0x3   :  { %s71_s11 = scalar_lea.vmem %s18_s10, 256  ;;  %p76_p1 = scmp.lt.s32.totalorder %s18_s10, %s18_s10 }
   0x4   :  { %p72_p0 = scmp.ne.s32.totalorder %s18_s10, %s71_s11  ;;  %p77_p2 = scmp.lt.s32.totalorder %s71_s11, %s71_s11 }
   0x6   :  { %p78_p3 = por %p77_p2, %p76_p1 }
   0x8   :  { %p79_p4 = pnand %p78_p3, %p72_p0 }
   0xa   :  { %82 = shalt.err (!%p79_p4)
}
   0xb   :  { %20 = dma.hbm_to_vmem [thread:$0]  %s136_s1, 256, %s18_s10, [#allocation3]  }
   0xc   :  { %103 = dma.done.wait [#allocation3], 256  }
   0xd   :  { %104 = vsyncadd [#allocation3], 4294967040  ;;  %v108_v0 = vmov 0   ;;  %v26_v1 = vld [vmem:[%s135_s0] sm:$0x3]  ;;  %v34_v4 = vlaneseq  ;;  %v25_v10 = vld [vmem:[#allocation2 + $0x8] sm:$0xff] }
   0xe   :  { %62 = vset.pattern.permute.xlu0 %v108_v0  ;;  %v109_v2 = vmov 269488144   ;;  %v24_v9 = vld [vmem:[#allocation2] sm:$0xff]  ;;  %s110_s16 = smov [#allocation5]  }
   0xf   :  { %29 = vperm.xlu0 %62, %v26_v1   ;;  %v32_v3 = vunpack.c.l.s4 %v109_v2  ;;  %v35_v6 = vshrl.u32 %v34_v4, 7  ;;  %s49_s1 = sshll.u32 %s110_s16, 4  ;;  %s50_s1 = int_to_ptr.vmem [resolvable:$true] %s49_s1 }
  0x10   :  { %s83_s17 = scalar_lea.vmem %s50_s1, 256  ;;  %p88_p6 = scmp.lt.s32.totalorder %s50_s1, %s50_s1 }
  0x11   :  { %v33_v5 = vunpack.c.0.s8 %v32_v3  ;;  %p84_p5 = scmp.ne.s32.totalorder %s50_s1, %s83_s17  ;;  %p89_p7 = scmp.lt.s32.totalorder %s83_s17, %s83_s17 }
  0x13   :  { %v36_v7 = vsub.s32 %v33_v5, %v35_v6  ;;  %p90_p8 = por %p89_p7, %p88_p6 }
  0x15   :  { %p91_p9 = pnand %p90_p8, %p84_p5 }
  0x8a   :  { %v30_v8 = vpop.permute.xlu0 %29 }
  0x8b   :  { %v37_v11 = vrot.slane %v30_v8, %v36_v7 }
  0x8d   :  { %v39_v12 = vmul.f32 %v37_v11, %v24_v9  ;;  %v40_v13 = vmul.f32 %v37_v11, %v25_v10 }
  0x8f   :  { %41 = vst [vmem:[#allocation5] sm:$0xff] %v39_v12  ;;  %42 = vst [vmem:[#allocation5 + $0x8] sm:$0xff] %v40_v13 }
  0x90   :  { %94 = shalt.err (!%p91_p9)
}
  0x91   :  { %52 = dma.vmem_to_hbm [thread:$0]  %s50_s1, 256, %s137_s2, [#allocation4]  }
  0x92   :  { %105 = dma.done.wait [#allocation4], 256  }
  0x93   :  { %106 = vsyncadd [#allocation4], 4294967040 }
  0x94   :  { %56 = vsyncpa [#allocation3], 1 }
  0x95   :  { %57 = vsyncpa [#allocation4], 1 }

</bundles_post_ra>
